<compile_context>
chip_gen: v6e
topology: v6e:2x2x1
jax: 0.10.0
libtpu: 0.0.40
codegen_flags: <defaults>
</compile_context>

<pallas_src>
import functools

import jax
import jax.numpy as jnp
from jax.experimental import pallas as pl
from jax.experimental.pallas import tpu as pltpu


def _round_up(x: int, m: int) -> int:
    return ((x + m - 1) // m) * m


def _cdiv(a: int, b: int) -> int:
    return (a + b - 1) // b


def _targetnet_kernel(x_ref, w1_ref, b1_ref, w2_ref, b2_ref, o_ref):
    # Hidden layer: x @ W1 + b1, ReLU on the VPU, then the output matmul.
    # x tile is (tb, K) with the true (small) K; hidden dim is lane-dense
    # (padded to 128 once at init); output is stored at the true width A.
    h = jnp.dot(x_ref[...], w1_ref[...], preferred_element_type=jnp.float32)
    h = jnp.maximum(h + b1_ref[...], 0.0)          # (tb, Hp) + (1, Hp)
    out = jnp.dot(h, w2_ref[...], preferred_element_type=jnp.float32)
    o_ref[...] = (out + b2_ref[...]).astype(o_ref.dtype)


def pad_targetnet_params(w1, b1, w2, b2):
    """Pad the hidden dim to a lane multiple (128) ONCE, outside the per-call
    path. Padded hidden units contribute exactly zero (zero weights, zero bias
    -> relu(0)=0 -> zero rows of W2), so the math is unchanged.

    w1: (n_states, hidden)   b1: (1, hidden)
    w2: (hidden, n_actions)  b2: (1, n_actions)
    """
    K, H = w1.shape
    A = w2.shape[1]
    Hp = _round_up(H, 128)
    f32 = jnp.float32
    w1_p = jnp.zeros((K, Hp), f32).at[:, :H].set(w1.astype(f32))
    b1_p = jnp.zeros((1, Hp), f32).at[:, :H].set(b1.astype(f32))
    w2_p = jnp.zeros((Hp, A), f32).at[:H, :].set(w2.astype(f32))
    b2_p = b2.astype(f32).reshape(1, A)
    return w1_p, b1_p, w2_p, b2_p


@functools.partial(jax.jit, static_argnames=("block_b",))
def targetnet_forward(x, w1_p, b1_p, w2_p, b2_p, *, block_b=512):
    """Forward pass of TargetNet: relu(x @ W1 + b1) @ W2 + b2.

    x:    (B, n_states)          float32 (unpadded)
    w1_p: (n_states, Hp)         float32 (pre-padded via pad_targetnet_params)
    b1_p: (1, Hp)                float32
    w2_p: (Hp, n_actions)        float32
    b2_p: (1, n_actions)         float32
    returns (B, n_actions)       float32
    """
    B, K = x.shape
    Hp = w1_p.shape[1]
    A = w2_p.shape[1]
    f32 = jnp.float32

    # Balanced batch tiling: pad B only to the sublane multiple (8); choose an
    # even number of tiles (>1 grids split evenly across v7x's two cores) with
    # tile size = balanced cdiv rounded up to 8.  tb <= round_up(block_b, 8),
    # which at the 512 default is far under every generation's VMEM budget.
    Bp8 = _round_up(B, 8)
    n = _cdiv(Bp8, block_b)
    if n > 1 and n % 2 == 1:
        n += 1                      # even grid -> 2-TC split on v7x
    tb = _round_up(_cdiv(Bp8, n), 8)
    Bp = n * tb

    x = x.astype(f32)
    if Bp != B:
        # Only batch rows are padded (<= tb-1 zero rows); their garbage output
        # is sliced off below.
        x_p = jnp.zeros((Bp, K), f32).at[:B, :].set(x)
    else:
        x_p = x

    cost = pl.CostEstimate(
        flops=2 * Bp * (K * Hp + Hp * A),
        transcendentals=0,
        # x read + out write + weights/biases read once (resident thereafter).
        bytes_accessed=4 * (Bp * K + Bp * A + K * Hp + Hp + Hp * A + A),
    )

    out_p = pl.pallas_call(
        _targetnet_kernel,
        out_shape=jax.ShapeDtypeStruct((Bp, A), f32),
        grid=(n,),
        in_specs=[
            pl.BlockSpec((tb, K), lambda i: (i, 0)),    # x: tiled batch, true K
            pl.BlockSpec((K, Hp), lambda i: (0, 0)),    # W1: resident
            pl.BlockSpec((1, Hp), lambda i: (0, 0)),    # b1: resident
            pl.BlockSpec((Hp, A), lambda i: (0, 0)),    # W2: resident, true A
            pl.BlockSpec((1, A), lambda i: (0, 0)),     # b2: resident
        ],
        out_specs=pl.BlockSpec((tb, A), lambda i: (i, 0)),  # true action width
        compiler_params=pltpu.CompilerParams(
            dimension_semantics=("parallel",),
        ),
        cost_estimate=cost,
    )(x_p, w1_p, b1_p, w2_p, b2_p)

    return out_p[:B, :] if Bp != B else out_p


def init_targetnet_params(key, n_states, n_actions, hidden_size):
    """Deterministic parameter init mirroring the PyTorch module:
    weights ~ Normal(0, 0.1); biases use PyTorch Linear default
    Uniform(-1/sqrt(fan_in), 1/sqrt(fan_in))."""
    k1, k2, k3, k4 = jax.random.split(key, 4)
    w1 = 0.1 * jax.random.normal(k1, (n_states, hidden_size), jnp.float32)
    bnd1 = 1.0 / jnp.sqrt(jnp.float32(n_states))
    b1 = jax.random.uniform(k2, (1, hidden_size), jnp.float32, -bnd1, bnd1)
    w2 = 0.1 * jax.random.normal(k3, (hidden_size, n_actions), jnp.float32)
    bnd2 = 1.0 / jnp.sqrt(jnp.float32(hidden_size))
    b2 = jax.random.uniform(k4, (1, n_actions), jnp.float32, -bnd2, bnd2)
    return w1, b1, w2, b2


if __name__ == "__main__":
    # Small shapes consistent with the module's forward: (batch, n_states).
    batch, n_states, n_actions, hidden_size = 2, 8, 4, 32

    key = jax.random.PRNGKey(0)
    kx, kp = jax.random.split(key)
    x = jax.random.normal(kx, (batch, n_states), jnp.float32)
    w1, b1, w2, b2 = init_targetnet_params(kp, n_states, n_actions, hidden_size)

    # Pad parameters ONCE (not in the per-call path).
    w1_p, b1_p, w2_p, b2_p = pad_targetnet_params(w1, b1, w2, b2)

    out = targetnet_forward(x, w1_p, b1_p, w2_p, b2_p)
    jax.block_until_ready(out)

    # Pure-JAX reference check (same math as the PyTorch module).
    ref = jnp.maximum(x @ w1 + b1, 0.0) @ w2 + b2
    assert out.shape == (batch, n_actions)
    assert jnp.allclose(out, ref, atol=1e-5, rtol=1e-5)

    # Also exercise a larger, multi-grid-step batch (balanced, even grid).
    big_b = 1030
    xb = jax.random.normal(jax.random.PRNGKey(1), (big_b, n_states), jnp.float32)
    out_b = targetnet_forward(xb, w1_p, b1_p, w2_p, b2_p)
    jax.block_until_ready(out_b)
    ref_b = jnp.maximum(xb @ w1 + b1, 0.0) @ w2 + b2
    assert out_b.shape == (big_b, n_actions)
    assert jnp.allclose(out_b, ref_b, atol=1e-4, rtol=1e-4)

    print("KERNEL_OK")
</pallas_src>

<mosaic_0001>
module attributes {stable_mosaic.version = 11 : i64} {
  func.func @_targetnet_kernel(%arg0: i32, %arg1: memref<8x8xf32, #tpu.memory_space<vmem>>, %arg2: memref<8x128xf32, #tpu.memory_space<vmem>>, %arg3: memref<1x128xf32, #tpu.memory_space<vmem>>, %arg4: memref<128x4xf32, #tpu.memory_space<vmem>>, %arg5: memref<1x4xf32, #tpu.memory_space<vmem>>, %arg6: memref<8x4xf32, #tpu.memory_space<vmem>>) attributes {dimension_semantics = [#tpu.dimension_semantics<parallel>], iteration_bounds = array<i64: 1>, scalar_prefetch = 0 : i64, scratch_operands = 0 : i64, tpu.core_type = #tpu.core_type<tc>, window_params = [{transform_indices = @transform_0, window_bounds = array<i64: 8, 8>}, {pipeline_mode = #tpu.pipeline_mode<synchronous>, transform_indices = @transform_1, window_bounds = array<i64: 8, 128>}, {pipeline_mode = #tpu.pipeline_mode<synchronous>, transform_indices = @transform_2, window_bounds = array<i64: 1, 128>}, {pipeline_mode = #tpu.pipeline_mode<synchronous>, transform_indices = @transform_3, window_bounds = array<i64: 128, 4>}, {pipeline_mode = #tpu.pipeline_mode<synchronous>, transform_indices = @transform_4, window_bounds = array<i64: 1, 4>}, {transform_indices = @transform_5, window_bounds = array<i64: 8, 4>}]} {
    %c0 = arith.constant 0 : index
    %c0_0 = arith.constant 0 : index
    %0 = vector.load %arg1[%c0, %c0_0] : memref<8x8xf32, #tpu.memory_space<vmem>>, vector<8x8xf32>
    %c0_1 = arith.constant 0 : index
    %c0_2 = arith.constant 0 : index
    %1 = vector.load %arg2[%c0_1, %c0_2] : memref<8x128xf32, #tpu.memory_space<vmem>>, vector<8x128xf32>
    %cst = arith.constant dense<0.000000e+00> : vector<8x128xf32>
    %2 = tpu.matmul %0, %1, %cst {dimension_numbers = #tpu.dot_dimension_numbers<[1], [0], [0], [1], [0, 0, 1, 1], [], []>} : vector<8x8xf32>, vector<8x128xf32>, vector<8x128xf32> -> vector<8x128xf32>
    %c0_3 = arith.constant 0 : index
    %c0_4 = arith.constant 0 : index
    %3 = vector.load %arg3[%c0_3, %c0_4] : memref<1x128xf32, #tpu.memory_space<vmem>>, vector<1x128xf32>
    %4 = vector.broadcast %3 : vector<1x128xf32> to vector<8x128xf32>
    %5 = arith.addf %2, %4 : vector<8x128xf32>
    %cst_5 = arith.constant 0.000000e+00 : f32
    %6 = vector.broadcast %cst_5 : f32 to vector<8x128xf32>
    %7 = arith.maximumf %5, %6 : vector<8x128xf32>
    %c0_6 = arith.constant 0 : index
    %c0_7 = arith.constant 0 : index
    %8 = vector.load %arg4[%c0_6, %c0_7] : memref<128x4xf32, #tpu.memory_space<vmem>>, vector<128x4xf32>
    %cst_8 = arith.constant dense<0.000000e+00> : vector<8x4xf32>
    %9 = tpu.matmul %7, %8, %cst_8 {dimension_numbers = #tpu.dot_dimension_numbers<[1], [0], [0], [1], [0, 0, 1, 1], [], []>} : vector<8x128xf32>, vector<128x4xf32>, vector<8x4xf32> -> vector<8x4xf32>
    %c0_9 = arith.constant 0 : index
    %c0_10 = arith.constant 0 : index
    %10 = vector.load %arg5[%c0_9, %c0_10] : memref<1x4xf32, #tpu.memory_space<vmem>>, vector<1x4xf32>
    %11 = vector.broadcast %10 : vector<1x4xf32> to vector<8x4xf32>
    %12 = arith.addf %9, %11 : vector<8x4xf32>
    %c0_11 = arith.constant 0 : index
    %c0_12 = arith.constant 0 : index
    %13 = vector.load %arg6[%c0_11, %c0_12] : memref<8x4xf32, #tpu.memory_space<vmem>>, vector<8x4xf32>
    tpu.vector_store %arg6[%c0_11, %c0_12], %12 {strides = array<i32>} : memref<8x4xf32, #tpu.memory_space<vmem>>, vector<8x4xf32>,
    return
  }
  func.func @transform_0(%arg0: i32) -> (i32, i32) {
    %c0_i32 = arith.constant 0 : i32
    %c0_i32_0 = arith.constant 0 : i32
    return %arg0, %c0_i32 : i32, i32
  }
  func.func @transform_1(%arg0: i32) -> (i32, i32) {
    %c0_i32 = arith.constant 0 : i32
    %c0_i32_0 = arith.constant 0 : i32
    %c0_i32_1 = arith.constant 0 : i32
    return %c0_i32, %c0_i32_0 : i32, i32
  }
  func.func @transform_2(%arg0: i32) -> (i32, i32) {
    %c0_i32 = arith.constant 0 : i32
    %c0_i32_0 = arith.constant 0 : i32
    %c0_i32_1 = arith.constant 0 : i32
    return %c0_i32, %c0_i32_0 : i32, i32
  }
  func.func @transform_3(%arg0: i32) -> (i32, i32) {
    %c0_i32 = arith.constant 0 : i32
    %c0_i32_0 = arith.constant 0 : i32
    %c0_i32_1 = arith.constant 0 : i32
    return %c0_i32, %c0_i32_0 : i32, i32
  }
  func.func @transform_4(%arg0: i32) -> (i32, i32) {
    %c0_i32 = arith.constant 0 : i32
    %c0_i32_0 = arith.constant 0 : i32
    %c0_i32_1 = arith.constant 0 : i32
    return %c0_i32, %c0_i32_0 : i32, i32
  }
  func.func @transform_5(%arg0: i32) -> (i32, i32) {
    %c0_i32 = arith.constant 0 : i32
    %c0_i32_0 = arith.constant 0 : i32
    return %arg0, %c0_i32 : i32, i32
  }
}

</mosaic_0001>

<bundles_post_ra>
// kernel: targetnet_forward.1
= control target key start
LH: loop header
LB: loop body
LE: loop exit
PB: predicated region body
PF: predicated region fallthrough
CT: control target
= control target key end

     0   :  { %vm29_vm0 = vcmask 64512   ;;  %v267_v0 = vmov 0.0   ;;  %vm268_vm1 = vmmov 0   ;;  %vm197_vm2 = vcmask 31744   ;;  %s362_s1 = inlined_call_operand.vmem [shape: f32[8,128], index: 1, kind: input, shape index: {}]   ;;  %s363_s0 = inlined_call_operand.vmem [shape: f32[8,8], index: 0, kind: input, shape index: {}]   ;;  %s364_s3 = inlined_call_operand.vmem [shape: f32[128,4], index: 3, kind: input, shape index: {}]   ;;  %s365_s2 = inlined_call_operand.vmem [shape: f32[1,128], index: 2, kind: input, shape index: {}]   ;;  %s366_s4 = inlined_call_operand.vmem [shape: f32[1,4], index: 4, kind: input, shape index: {}]   ;;  %s367_s5 = inlined_call_operand.vmem [shape: f32[8,4], index: 5, kind: output, shape index: {}]  }
   0x1   :  { %225 = vmatprep.subr.mxu0 %v267_v0  ;;  %v21_v1 = vld [vmem:[%s362_s1] sm:$0xff]  ;;  %227 = vmatprep.mubr.msk.f32.mxu0 %vm268_vm1, %v267_v0  ;;  %v119_v3 = vld [vmem:[%s364_s3 + $0x78] sm:$0xff]  ;;  %v118_v4 = vld [vmem:[%s364_s3 + $0x70] sm:$0xff] }
   0x2   :  { %v20_v2 = vld [vmem:[%s363_s0] sm:$0xff]  ;;  %226 = vmatpush3.msra.mxu0 %v21_v1  ;;  %230 = vmatprep.subr.mxu1 %v267_v0  ;;  %v117_v5 = vld [vmem:[%s364_s3 + $0x68] sm:$0xff]  ;;  %v115_v7 = vld [vmem:[%s364_s3 + $0x58] sm:$0xff] }
   0x3   :  { %228 = vmatmul.mubr.msk.f32.vlgmr.msra.gmra.mxu0 %vm29_vm0, %v20_v2  ;;  %231 = vmatpush3.msra.mxu1 %v119_v3  ;;  %v116_v6 = vld [vmem:[%s364_s3 + $0x60] sm:$0xff]  ;;  %v114_v8 = vld [vmem:[%s364_s3 + $0x50] sm:$0xff]  ;;  %v113_v9 = vld [vmem:[%s364_s3 + $0x48] sm:$0xff] }
   0x4   :  { %232 = vmatprep.subr.mxu1 %v267_v0  ;;  %262 = vmatprep.mubr.msk.f32.mxu1 %vm268_vm1, %v267_v0  ;;  %v112_v10 = vld [vmem:[%s364_s3 + $0x40] sm:$0xff]  ;;  %v111_v11 = vld [vmem:[%s364_s3 + $0x38] sm:$0xff]  ;;  %v110_v12 = vld [vmem:[%s364_s3 + $0x30] sm:$0xff] }
   0x5   :  { %233 = vmatpush3.msra.mxu1 %v118_v4  ;;  %v109_v13 = vld [vmem:[%s364_s3 + $0x28] sm:$0xff]  ;;  %v108_v14 = vld [vmem:[%s364_s3 + $0x20] sm:$0xff]  ;;  %v107_v15 = vld [vmem:[%s364_s3 + $0x18] sm:$0xff] }
   0x6   :  { %234 = vmatprep.subr.mxu1 %v267_v0  ;;  %v106_v16 = vld [vmem:[%s364_s3 + $0x10] sm:$0xff]  ;;  %v105_v17 = vld [vmem:[%s364_s3 + $0x8] sm:$0xff]  ;;  %v104_v18 = vld [vmem:[%s364_s3] sm:$0xff] }
   0x7   :  { %235 = vmatpush3.msra.mxu1 %v117_v5  ;;  %v203_v19 = vld [vmem:[%s365_s2] ss:$0 sm:$0xff] }
   0x8   :  { %236 = vmatprep.subr.mxu1 %v267_v0  ;;  %v205_v24 = vld [vmem:[%s366_s4] ss:$0 sm:$0xff] }
   0x9   :  { %237 = vmatpush3.msra.mxu1 %v116_v6 }
   0xa   :  { %238 = vmatprep.subr.mxu1 %v267_v0 }
   0xb   :  { %239 = vmatpush3.msra.mxu1 %v115_v7 }
   0xc   :  { %240 = vmatprep.subr.mxu1 %v267_v0 }
   0xd   :  { %241 = vmatpush3.msra.mxu1 %v114_v8 }
   0xe   :  { %242 = vmatprep.subr.mxu1 %v267_v0 }
   0xf   :  { %243 = vmatpush3.msra.mxu1 %v113_v9 }
  0x10   :  { %244 = vmatprep.subr.mxu1 %v267_v0 }
  0x11   :  { %245 = vmatpush3.msra.mxu1 %v112_v10 }
  0x12   :  { %246 = vmatprep.subr.mxu1 %v267_v0 }
  0x13   :  { %247 = vmatpush3.msra.mxu1 %v111_v11 }
  0x14   :  { %248 = vmatprep.subr.mxu1 %v267_v0 }
  0x15   :  { %249 = vmatpush3.msra.mxu1 %v110_v12 }
  0x16   :  { %250 = vmatprep.subr.mxu1 %v267_v0 }
  0x17   :  { %251 = vmatpush3.msra.mxu1 %v109_v13 }
  0x18   :  { %252 = vmatprep.subr.mxu1 %v267_v0 }
  0x19   :  { %253 = vmatpush3.msra.mxu1 %v108_v14 }
  0x1a   :  { %254 = vmatprep.subr.mxu1 %v267_v0 }
  0x1b   :  { %255 = vmatpush3.msra.mxu1 %v107_v15 }
  0x1c   :  { %256 = vmatprep.subr.mxu1 %v267_v0 }
  0x1d   :  { %257 = vmatpush3.msra.mxu1 %v106_v16 }
  0x1e   :  { %258 = vmatprep.subr.mxu1 %v267_v0 }
  0x1f   :  { %259 = vmatpush3.msra.mxu1 %v105_v17 }
  0x20   :  { %260 = vmatprep.subr.mxu1 %v267_v0 }
  0x21   :  { %261 = vmatpush3.msra.mxu1 %v104_v18 }
  0xc3   :  { %v99_v20 = vpop.f32.mrf.mxu0 }
  0xc4   :  { %v100_v21 = vadd.f32 %v203_v19, %v99_v20 }
  0xc5   :  { %v229_v22 = vpop.f32.mrf.mxu0 }
  0xc6   :  { %v103_v23 = vmax.f32 %v100_v21, 0.0 }
  0xc8   :  { %263 = vmatmul.mubr.f32.vlgmr.msra.gmra.mxu1 %v103_v23 }
 0x188   :  { %v193_v25 = vpop.f32.mrf.mxu1 }
 0x189   :  { %v194_v26 = vadd.f32 %v205_v24, %v193_v25 }
 0x18a   :  { %v264_v27 = vpop.f32.mrf.mxu1 }
 0x18b   :  { %198 = vst.msk [vmem:[%s367_s5] sm:$0xff] %vm197_vm2, %v194_v26 }

</bundles_post_ra>
